<compile_context>
chip_gen: v7x
topology: tpu7x:2x2x1
jax: 0.10.0
libtpu: 0.0.40
codegen_flags: <defaults>
</compile_context>

<pallas_src>
import math

import jax
import jax.numpy as jnp
from jax.experimental import pallas as pl
from jax.experimental.pallas import tpu as pltpu

_EPS = 1e-5     # PyTorch BatchNorm1d default eps
_SLOPE = 0.01   # PyTorch LeakyReLU default negative_slope
_FEAT = 256     # feature width of the postprocess head


def _round_up(x, m):
    return ((x + m - 1) // m) * m


def ramannet_postprocess_kernel(top_ref, bn_ref, wc_ref, bc_ref, cls_ref):
    # top_ref: (TB, 256) f32      activation tile
    # bn_ref:  (2, 256)  f32      row 0: scale = gamma * rsqrt(var + eps); row 1: shift
    # wc_ref:  (256, NC_PAD) bf16 classifier weight, zero-padded to lane-dense width
    # bc_ref:  (1, NC_PAD)  f32   classifier bias, zero-padded
    # cls_ref: (TB, NC_PAD) f32   output logits tile
    bn = bn_ref[...]
    scale = bn[0:1, :]
    shift = bn[1:2, :]

    h = top_ref[...] * scale + shift               # eval-mode BatchNorm1d (folded affine, f32)
    h = jnp.maximum(h, _SLOPE * h)                 # LeakyReLU(0.01) — single VPU op
    # TODO(synk): Dropout(0.25) is identity in eval mode (inference kernel).

    logits = jnp.dot(h.astype(wc_ref.dtype), wc_ref[...],
                     preferred_element_type=jnp.float32) + bc_ref[...]
    cls_ref[...] = logits.astype(cls_ref.dtype)


def prepare_params(params):
    """One-time repacking of module parameters (hoisted out of the per-call path).

    params: {"bn": (4, 256) [gamma, beta, mean, var], "wc": (256, n_classes), "bc": (n_classes,)}.
    """
    gamma, beta, mean, var = params["bn"]
    scale = (gamma * jax.lax.rsqrt(var + _EPS)).astype(jnp.float32)
    shift = (beta - mean * scale).astype(jnp.float32)
    bn_affine = jnp.stack([scale, shift])                          # (2, 256) f32

    n_classes = params["wc"].shape[1]
    nc_pad = _round_up(max(n_classes, 128), 128)
    wc = jnp.zeros((_FEAT, nc_pad), jnp.bfloat16).at[:, :n_classes].set(
        params["wc"].astype(jnp.bfloat16))                         # (256, NC_PAD) bf16
    bc = jnp.zeros((1, nc_pad), jnp.float32).at[0, :n_classes].set(
        params["bc"].astype(jnp.float32))                          # (1, NC_PAD) f32
    return {"bn_affine": bn_affine, "wc": wc, "bc": bc, "n_classes": n_classes}


def ramannet_postprocess_forward(top, prepared, *, batch_tile=2048):
    """top: (B, 256) f32.  prepared: output of prepare_params().  Returns (B, n_classes) f32."""
    B, F = top.shape
    assert F == _FEAT
    n_classes = prepared["n_classes"]
    nc_pad = prepared["wc"].shape[1]

    # Large batch tile (HBM-bound kernel), but keep >= 2 grid steps when B > 8 so the
    # "parallel" batch axis can shard across both v7x TensorCores.  No batch padding:
    # the last grid step is a (masked) edge block.
    tb = max(8, min(batch_tile, _round_up(pl.cdiv(B, 2), 8)))
    grid = (pl.cdiv(B, tb),)

    out = pl.pallas_call(
        ramannet_postprocess_kernel,
        out_shape=jax.ShapeDtypeStruct((B, nc_pad), jnp.float32),
        grid=grid,
        in_specs=[
            pl.BlockSpec((tb, _FEAT), lambda i: (i, 0)),           # batch-tiled activations
            pl.BlockSpec((2, _FEAT), lambda i: (0, 0),
                         pipeline_mode=pl.Buffered(1)),            # BN scale/shift (resident)
            pl.BlockSpec((_FEAT, nc_pad), lambda i: (0, 0),
                         pipeline_mode=pl.Buffered(1)),            # classifier W (resident)
            pl.BlockSpec((1, nc_pad), lambda i: (0, 0),
                         pipeline_mode=pl.Buffered(1)),            # classifier b (resident)
        ],
        out_specs=pl.BlockSpec((tb, nc_pad), lambda i: (i, 0)),
        compiler_params=pltpu.CompilerParams(
            dimension_semantics=("parallel",),
        ),
    )(top.astype(jnp.float32), prepared["bn_affine"], prepared["wc"], prepared["bc"])

    return out[:, :n_classes]


def init_params(key, n_classes):
    """Deterministic synthetic parameters matching RamanNet_postprocess.__init__ shapes."""
    ks = jax.random.split(key, 6)

    def lin_w(k, fan_in, shape):
        bound = 1.0 / math.sqrt(fan_in)
        return jax.random.uniform(k, shape, jnp.float32, -bound, bound)

    gamma = 1.0 + 0.1 * jax.random.normal(ks[0], (_FEAT,), jnp.float32)
    beta = 0.1 * jax.random.normal(ks[1], (_FEAT,), jnp.float32)
    mean = 0.1 * jax.random.normal(ks[2], (_FEAT,), jnp.float32)
    var = 0.5 + jax.random.uniform(ks[3], (_FEAT,), jnp.float32)  # strictly positive
    return {
        "bn": jnp.stack([gamma, beta, mean, var]).astype(jnp.float32),
        # Linear(256, n_classes), stored [in, out] (= transpose of nn.Linear.weight)
        "wc": lin_w(ks[4], _FEAT, (_FEAT, n_classes)),
        "bc": lin_w(ks[5], _FEAT, (n_classes,)),
    }


def reference_forward(top, params):
    """Pure-JAX f32 reference (eval-mode semantics of the PyTorch module)."""
    gamma, beta, mean, var = params["bn"]
    h = (top - mean) * jax.lax.rsqrt(var + _EPS) * gamma + beta
    h = jnp.where(h >= 0, h, _SLOPE * h)
    return jnp.dot(h, params["wc"], preferred_element_type=jnp.float32) + params["bc"]


if __name__ == "__main__":
    # Small shapes consistent with the module: batch=4, features=256, n_classes=10.
    B, N_CLASSES = 4, 10

    key = jax.random.PRNGKey(0)
    k_x, k_p = jax.random.split(key)
    top = jax.random.normal(k_x, (B, _FEAT), dtype=jnp.float32)
    params = init_params(k_p, N_CLASSES)

    prepared = prepare_params(params)                 # one-time parameter repacking
    cls = ramannet_postprocess_forward(top, prepared)
    cls = jax.block_until_ready(cls)
    assert cls.shape == (B, N_CLASSES)

    ref = reference_forward(top, params)
    max_err = float(jnp.max(jnp.abs(cls - ref)))
    # Tolerance widened slightly vs. a pure-f32 path: the classifier matmul runs with
    # bf16 MXU inputs (f32 accumulation); BN affine + LeakyReLU stay in f32.
    assert jnp.allclose(cls, ref, atol=2e-2, rtol=2e-2), max_err

    print("KERNEL_OK")
</pallas_src>

<mosaic_0001>
module attributes {stable_mosaic.version = 11 : i64} {
  func.func @ramannet_postprocess_kernel(%arg0: i32, %arg1: memref<8x256xf32, #tpu.memory_space<vmem>>, %arg2: memref<2x256xf32, #tpu.memory_space<vmem>>, %arg3: memref<256x128xbf16, #tpu.memory_space<vmem>>, %arg4: memref<1x128xf32, #tpu.memory_space<vmem>>, %arg5: memref<8x128xf32, #tpu.memory_space<vmem>>) attributes {dimension_semantics = [#tpu.dimension_semantics<parallel>], iteration_bounds = array<i64: 1>, scalar_prefetch = 0 : i64, scratch_operands = 0 : i64, tpu.core_type = #tpu.core_type<tc>, window_params = [{transform_indices = @transform_0, window_bounds = array<i64: 8, 256>}, {pipeline_mode = #tpu.pipeline_mode<synchronous>, transform_indices = @transform_1, window_bounds = array<i64: 2, 256>}, {pipeline_mode = #tpu.pipeline_mode<synchronous>, transform_indices = @transform_2, window_bounds = array<i64: 256, 128>}, {pipeline_mode = #tpu.pipeline_mode<synchronous>, transform_indices = @transform_3, window_bounds = array<i64: 1, 128>}, {transform_indices = @transform_4, window_bounds = array<i64: 8, 128>}]} {
    %c0 = arith.constant 0 : index
    %c0_0 = arith.constant 0 : index
    %0 = vector.load %arg2[%c0, %c0_0] : memref<2x256xf32, #tpu.memory_space<vmem>>, vector<2x256xf32>
    %1 = vector.extract_strided_slice %0 {offsets = [0, 0], sizes = [1, 256], strides = [1, 1]} : vector<2x256xf32> to vector<1x256xf32>
    %2 = vector.extract_strided_slice %0 {offsets = [1, 0], sizes = [1, 256], strides = [1, 1]} : vector<2x256xf32> to vector<1x256xf32>
    %c0_1 = arith.constant 0 : index
    %c0_2 = arith.constant 0 : index
    %3 = vector.load %arg1[%c0_1, %c0_2] : memref<8x256xf32, #tpu.memory_space<vmem>>, vector<8x256xf32>
    %4 = vector.broadcast %1 : vector<1x256xf32> to vector<8x256xf32>
    %5 = arith.mulf %3, %4 : vector<8x256xf32>
    %6 = vector.broadcast %2 : vector<1x256xf32> to vector<8x256xf32>
    %7 = arith.addf %5, %6 : vector<8x256xf32>
    %cst = arith.constant 0.00999999977 : f32
    %8 = vector.broadcast %cst : f32 to vector<8x256xf32>
    %9 = arith.mulf %8, %7 : vector<8x256xf32>
    %10 = arith.maximumf %7, %9 : vector<8x256xf32>
    %11 = arith.truncf %10 : vector<8x256xf32> to vector<8x256xbf16>
    %c0_3 = arith.constant 0 : index
    %c0_4 = arith.constant 0 : index
    %12 = vector.load %arg3[%c0_3, %c0_4] : memref<256x128xbf16, #tpu.memory_space<vmem>>, vector<256x128xbf16>
    %cst_5 = arith.constant dense<0.000000e+00> : vector<8x128xf32>
    %13 = tpu.matmul %11, %12, %cst_5 {dimension_numbers = #tpu.dot_dimension_numbers<[1], [0], [0], [1], [0, 0, 1, 1], [], []>} : vector<8x256xbf16>, vector<256x128xbf16>, vector<8x128xf32> -> vector<8x128xf32>
    %c0_6 = arith.constant 0 : index
    %c0_7 = arith.constant 0 : index
    %14 = vector.load %arg4[%c0_6, %c0_7] : memref<1x128xf32, #tpu.memory_space<vmem>>, vector<1x128xf32>
    %15 = vector.broadcast %14 : vector<1x128xf32> to vector<8x128xf32>
    %16 = arith.addf %13, %15 : vector<8x128xf32>
    %c0_8 = arith.constant 0 : index
    %c0_9 = arith.constant 0 : index
    %17 = vector.load %arg5[%c0_8, %c0_9] : memref<8x128xf32, #tpu.memory_space<vmem>>, vector<8x128xf32>
    tpu.vector_store %arg5[%c0_8, %c0_9], %16 {strides = array<i32>} : memref<8x128xf32, #tpu.memory_space<vmem>>, vector<8x128xf32>,
    return
  }
  func.func @transform_0(%arg0: i32) -> (i32, i32) {
    %c0_i32 = arith.constant 0 : i32
    %c0_i32_0 = arith.constant 0 : i32
    return %arg0, %c0_i32 : i32, i32
  }
  func.func @transform_1(%arg0: i32) -> (i32, i32) {
    %c0_i32 = arith.constant 0 : i32
    %c0_i32_0 = arith.constant 0 : i32
    %c0_i32_1 = arith.constant 0 : i32
    return %c0_i32, %c0_i32_0 : i32, i32
  }
  func.func @transform_2(%arg0: i32) -> (i32, i32) {
    %c0_i32 = arith.constant 0 : i32
    %c0_i32_0 = arith.constant 0 : i32
    %c0_i32_1 = arith.constant 0 : i32
    return %c0_i32, %c0_i32_0 : i32, i32
  }
  func.func @transform_3(%arg0: i32) -> (i32, i32) {
    %c0_i32 = arith.constant 0 : i32
    %c0_i32_0 = arith.constant 0 : i32
    %c0_i32_1 = arith.constant 0 : i32
    return %c0_i32, %c0_i32_0 : i32, i32
  }
  func.func @transform_4(%arg0: i32) -> (i32, i32) {
    %c0_i32 = arith.constant 0 : i32
    %c0_i32_0 = arith.constant 0 : i32
    return %arg0, %c0_i32 : i32, i32
  }
}

</mosaic_0001>

<bundles_post_ra>
// kernel: tpu_custom_call.1
= control target key start
LH: loop header
LB: loop body
LE: loop exit
PB: predicated region body
PF: predicated region fallthrough
CT: control target
= control target key end

     0   :  { %9 = vsyncpa [#allocation3], 0  ;;  %s575_s0 = inlined_call_operand.hbm [shape: f32[4,256], index: 0, kind: input, shape index: {}]   ;;  %s576_s1 = inlined_call_operand.hbm [shape: f32[2,256], index: 1, kind: input, shape index: {}]   ;;  %s577_s2 = inlined_call_operand.hbm [shape: bf16[256,128], index: 2, kind: input, shape index: {}]   ;;  %s578_s3 = inlined_call_operand.vmem [shape: f32[1,128], index: 3, kind: input, shape index: {}]   ;;  %s579_s4 = inlined_call_operand.hbm [shape: f32[4,128], index: 4, kind: output, shape index: {}]  }
   0x1   :  { %10 = vsyncpa [#allocation6], 0 }
   0x2   :  { %11 = vsyncpa [#allocation4], 0 }
   0x3   :  { %16 = vsyncadd [#allocation3], 128  ;;  %s477_s15 = smov [#allocation5]   ;;  %s478_s17 = smov [#allocation2]  }
   0x4   :  { %s30_s16 = sshll.u32 %s477_s15, 4  ;;  %s17_s18 = sshll.u32 %s478_s17, 4  ;;  %s31_s16 = int_to_ptr.vmem [resolvable:$true] %s30_s16  ;;  %s510_s18 = int_to_ptr.vmem [resolvable:$true] %s17_s18 }
   0x5   :  { %s383_s21 = scalar_lea.hbm %s576_s1, 64 }
   0x6   :  { %p384_p0 = scmp.ne.s32.totalorder %s576_s1, %s383_s21  ;;  %p387_p1 = scmp.lt.u32.totalorder %s383_s21, %s576_s1 }
   0x8   :  { %p389_p2 = pnand %p387_p1, %p384_p0 }
   0xa   :  { %392 = shalt.err (!%p389_p2)
}
   0xb   :  { %s393_s26 = scalar_lea.vmem %s31_s16, 64  ;;  %p398_p4 = scmp.lt.s32.totalorder %s31_s16, %s31_s16 }
   0xc   :  { %p394_p3 = scmp.ne.s32.totalorder %s31_s16, %s393_s26  ;;  %p399_p5 = scmp.lt.s32.totalorder %s393_s26, %s393_s26 }
   0xe   :  { %p400_p6 = por %p399_p5, %p398_p4 }
  0x10   :  { %p401_p7 = pnand %p400_p6, %p394_p3 }
  0x12   :  { %404 = shalt.err (!%p401_p7)
}
  0x13   :  { %33 = dma.hbm_to_vmem [thread:$0]  %s576_s1, 64, %s31_s16, [#allocation6]  }
  0x14   :  { %s405_s5 = scalar_lea.hbm %s575_s0, 128 }
  0x15   :  { %p406_p8 = scmp.ne.s32.totalorder %s575_s0, %s405_s5  ;;  %p409_p9 = scmp.lt.u32.totalorder %s405_s5, %s575_s0 }
  0x17   :  { %p411_p10 = pnand %p409_p9, %p406_p8 }
  0x19   :  { %414 = shalt.err (!%p411_p10)
}
  0x1a   :  { %s415_s10 = scalar_lea.vmem %s510_s18, 128  ;;  %s419_s1 = scalar_lea.vmem %s510_s18, 256 }
  0x1b   :  { %p416_p11 = scmp.ne.s32.totalorder %s510_s18, %s415_s10  ;;  %p420_p12 = scmp.lt.s32.totalorder %s510_s18, %s510_s18 }
  0x1c   :  { %p421_p13 = scmp.lt.s32.totalorder %s419_s1, %s415_s10 }
  0x1e   :  { %p422_p0 = por %p421_p13, %p420_p12 }
  0x20   :  { %p423_p1 = pnand %p422_p0, %p416_p11 }
  0x22   :  { %426 = shalt.err (!%p423_p1)
}
  0x23   :  { %s479_s11 = smov 128   ;;  %s480_s12 = smov 8  }
  0x24   :  { %23 = dma.hbm_to_vmem [thread:$0]  %s575_s0, 128, %s510_s18, [#allocation3], %s479_s11, %s479_s11, %s480_s12  }
  0x25   :  { %s481_s15 = smov [#allocation7]   ;;  %s427_s20 = scalar_lea.hbm %s577_s2, 2048 }
  0x26   :  { %s39_s16 = sshll.u32 %s481_s15, 4  ;;  %p428_p2 = scmp.ne.s32.totalorder %s577_s2, %s427_s20  ;;  %s40_s16 = int_to_ptr.vmem [resolvable:$true] %s39_s16 }
  0x27   :  { %p431_p3 = scmp.lt.u32.totalorder %s427_s20, %s577_s2 }
  0x29   :  { %p433_p4 = pnand %p431_p3, %p428_p2 }
  0x2b   :  { %436 = shalt.err (!%p433_p4)
}
  0x2c   :  { %s437_s25 = scalar_lea.vmem %s40_s16, 2048  ;;  %p442_p6 = scmp.lt.s32.totalorder %s40_s16, %s40_s16 }
  0x2d   :  { %p438_p5 = scmp.ne.s32.totalorder %s40_s16, %s437_s25  ;;  %p443_p7 = scmp.lt.s32.totalorder %s437_s25, %s437_s25 }
  0x2f   :  { %p444_p8 = por %p443_p7, %p442_p6 }
  0x31   :  { %p445_p9 = pnand %p444_p8, %p438_p5 }
  0x33   :  { %448 = shalt.err (!%p445_p9)
}
  0x34   :  { %s482_s0 = smov 64   ;;  %s483_s18 = smov 4  }
  0x35   :  { %45 = dma.hbm_to_vmem [thread:$0]  %s577_s2, 2048, %s40_s16, [#allocation6], %s482_s0, %s482_s0, %s483_s18  }
  0x36   :  { %471 = dma.done.wait [#allocation3], 256  }
  0x37   :  { %472 = vsyncadd [#allocation3], 4294967040 }
  0x38   :  { %473 = dma.done.wait [#allocation6], 2112  }
  0x39   :  { %474 = vsyncadd [#allocation6], 4294965184  ;;  %v367_v0 = vld [vmem:[#allocation7 + $0x40] sm:$0xff]   ;;  %v369_v2 = vld [vmem:[#allocation7 + $0x48] sm:$0xff]   ;;  %v62_v4 = vlaneseq }
  0x3a   :  { %v368_v1 = vld [vmem:[#allocation7] sm:$0xff]   ;;  %337 = vmatprep.subr.bf16.mxu0 %v367_v0  ;;  %v370_v3 = vld [vmem:[#allocation7 + $0x8] sm:$0xff]   ;;  %v371_v5 = vld [vmem:[#allocation7 + $0x50] sm:$0xff]  }
  0x3b   :  { %338 = vmatpush3.bf16.msra.mxu0 %v368_v1  ;;  %v372_v6 = vld [vmem:[#allocation7 + $0x10] sm:$0xff]   ;;  %v63_v7 = vshrl.u32 %v62_v4, 7  ;;  %v373_v8 = vld [vmem:[#allocation7 + $0x58] sm:$0xff]   ;;  %v375_v11 = vld [vmem:[#allocation7 + $0x60] sm:$0xff]  }
  0x3c   :  { %339 = vmatprep.subr.bf16.mxu0 %v369_v2  ;;  %v374_v9 = vld [vmem:[#allocation7 + $0x18] sm:$0xff]   ;;  %v376_v15 = vld [vmem:[#allocation7 + $0x20] sm:$0xff]   ;;  %v377_v16 = vld [vmem:[#allocation7 + $0x68] sm:$0xff]  }
  0x3d   :  { %v64_v10 = vsub.s32 0, %v63_v7  ;;  %v68_v12 = vsub.s32 2, %v63_v7  ;;  %v90_v13 = vsub.s32 1, %v63_v7  ;;  %v94_v14 = vsub.s32 3, %v63_v7  ;;  %v58_v17 = vld [vmem:[#allocation5] sm:$0xf] }
  0x3e   :  { %v378_v22 = vld [vmem:[#allocation7 + $0x28] sm:$0xff]   ;;  %v379_v27 = vld [vmem:[#allocation7 + $0x70] sm:$0xff]   ;;  %v381_v37 = vld [vmem:[#allocation7 + $0x78] sm:$0xff]  }
  0x3f   :  { %340 = vmatpush3.bf16.msra.mxu0 %v370_v3  ;;  %v65_v18 = vrot.slane %v58_v17, %v64_v10  ;;  %v69_v19 = vrot.slane %v58_v17, %v68_v12  ;;  %v91_v20 = vrot.slane %v58_v17, %v90_v13  ;;  %v95_v21 = vrot.slane %v58_v17, %v94_v14  ;;  %v59_v28 = vld [vmem:[#allocation2] sm:$0xff]  ;;  %v60_v29 = vld [vmem:[#allocation2 + $0x8] sm:$0xff] }
  0x40   :  { %341 = vmatprep.subr.bf16.mxu0 %v371_v5  ;;  %v380_v34 = vld [vmem:[#allocation7 + $0x30] sm:$0xff]   ;;  %v382_v40 = vld [vmem:[#allocation7 + $0x38] sm:$0xff]   ;;  %v320_v50 = vld [vmem:[%s578_s3] ss:$0 sm:$0xff] }
  0x41   :  { %v75_v23 = vrot.slane %v65_v18, %v64_v10  ;;  %v79_v24 = vrot.slane %v69_v19, %v64_v10  ;;  %v101_v25 = vrot.slane %v91_v20, %v90_v13  ;;  %v105_v26 = vrot.slane %v95_v21, %v90_v13 }
  0x43   :  { %342 = vmatpush3.bf16.msra.mxu0 %v372_v6  ;;  %v82_v30 = vcombine.low %v75_v23, %v79_v24  ;;  %v83_v31 = vcombine.high %v75_v23, %v79_v24  ;;  %v108_v32 = vcombine.low %v101_v25, %v105_v26  ;;  %v109_v33 = vcombine.high %v101_v25, %v105_v26 }
  0x44   :  { %343 = vmatprep.subr.bf16.mxu0 %v373_v8 }
  0x45   :  { %v86_v35 = vmul.f32 %v82_v30, %v59_v28  ;;  %v87_v36 = vmul.f32 %v83_v31, %v60_v29 }
  0x47   :  { %344 = vmatpush3.bf16.msra.mxu0 %v374_v9  ;;  %v112_v38 = vadd.f32 %v108_v32, %v86_v35  ;;  %v113_v39 = vadd.f32 %v109_v33, %v87_v36 }
  0x48   :  { %345 = vmatprep.subr.bf16.mxu0 %v375_v11 }
  0x49   :  { %v114_v41 = vmul.f32 0.01, %v112_v38  ;;  %v115_v42 = vmul.f32 0.01, %v113_v39 }
  0x4b   :  { %346 = vmatpush3.bf16.msra.mxu0 %v376_v15  ;;  %v116_v43 = vmax.f32 %v112_v38, %v114_v41  ;;  %v117_v44 = vmax.f32 %v113_v39, %v115_v42 }
  0x4c   :  { %347 = vmatprep.subr.bf16.mxu0 %v377_v16 }
  0x4d   :  { %v121_v45 = vcombine.high %v116_v43, %v117_v44  ;;  %v120_v46 = vcombine.low %v116_v43, %v117_v44 }
  0x4f   :  { %348 = vmatpush3.bf16.msra.mxu0 %v378_v22  ;;  %v125_v47 = vpack.c.bf16 %v121_v45, %v121_v45  ;;  %v124_v48 = vpack.c.bf16 %v120_v46, %v120_v46 }
  0x50   :  { %349 = vmatprep.subr.bf16.mxu0 %v379_v27 }
  0x51   :  { %293 = vmatprep.mubr.bf16.mxu0 %v125_v47 }
  0x53   :  { %350 = vmatpush3.bf16.msra.mxu0 %v380_v34 }
  0x54   :  { %351 = vmatprep.subr.bf16.mxu0 %v381_v37 }
  0x57   :  { %352 = vmatpush3.bf16.msra.mxu0 %v382_v40 }
  0x5a   :  { %294 = vmatmul.mubr.bf16.vlgmr.msra.gmra.mrb[0].mxu0 %v124_v48 }
 0x12d   :  { %v353_v49 = vpop.f32.mrb[0].mxu0 }
 0x12e   :  { %v354_v51 = vpop.f32.mrb[1].mxu0 }
 0x12f   :  { %v355_v52 = vadd.f32 %v354_v51, %v353_v49  ;;  %v356_v53 = vpop.f32.mrb[2].mxu0 }
 0x130   :  { %v357_v54 = vpop.f32.mrb[3].mxu0 }
 0x131   :  { %v296_v55 = vadd.f32 %v355_v52, %v320_v50 }
 0x133   :  { %301 = vst [vmem:[#allocation8] sm:$0xff] %v296_v55 }
 0x134   :  { %306 = vsyncadd [#allocation4], 64  ;;  %s484_s29 = smov [#allocation8]  }
 0x135   :  { %s307_s30 = sshll.u32 %s484_s29, 4  ;;  %s308_s30 = int_to_ptr.vmem [resolvable:$true] %s307_s30 }
 0x136   :  { %s449_s5 = scalar_lea.vmem %s308_s30, 64  ;;  %s453_s6 = scalar_lea.vmem %s308_s30, 128 }
 0x137   :  { %p450_p10 = scmp.ne.s32.totalorder %s308_s30, %s449_s5  ;;  %p454_p11 = scmp.lt.s32.totalorder %s308_s30, %s308_s30 }
 0x138   :  { %p455_p12 = scmp.lt.s32.totalorder %s453_s6, %s449_s5 }
 0x13a   :  { %p456_p13 = por %p455_p12, %p454_p11 }
 0x13c   :  { %p457_p0 = pnand %p456_p13, %p450_p10 }
 0x13e   :  { %460 = shalt.err (!%p457_p0)
}
 0x13f   :  { %s461_s8 = scalar_lea.hbm %s579_s4, 64 }
 0x140   :  { %p462_p1 = scmp.ne.s32.totalorder %s579_s4, %s461_s8  ;;  %p465_p2 = scmp.lt.u32.totalorder %s461_s8, %s579_s4 }
 0x142   :  { %p467_p3 = pnand %p465_p2, %p462_p1 }
 0x144   :  { %470 = shalt.err (!%p467_p3)
}
 0x145   :  { %313 = dma.vmem_to_hbm [thread:$0]  %s308_s30, 64, %s579_s4, [#allocation4], %s482_s0, %s482_s0, %s483_s18  }
 0x146   :  { %475 = dma.done.wait [#allocation4], 128  }
 0x147   :  { %476 = vsyncadd [#allocation4], 4294967168 }
 0x148   :  { %317 = vsyncpa [#allocation3], 1 }
 0x149   :  { %318 = vsyncpa [#allocation6], 1 }
 0x14a   :  { %319 = vsyncpa [#allocation4], 1 }

</bundles_post_ra>
